<compile_context>
chip_gen: v5e
topology: v5e:2x2
jax: 0.10.0
libtpu: 0.0.40
codegen_flags: <defaults>
</compile_context>

<pallas_src>
import functools
import numpy as np
import jax
import jax.numpy as jnp
from jax.experimental import pallas as pl
from jax.experimental.pallas import tpu as pltpu


def _attpool_kernel(q_ref, k_ref, wT_ref, b_ref, mask_ref, out_ref, attn_ref,
                    *, inv_temperature):
    # Per grid step (TB = batch tile):
    #   q_ref    : (TB, d_q)
    #   k_ref    : (TB, l, d_k)
    #   wT_ref   : (d_q, d_k)   pre-transposed nn.Linear weight
    #   b_ref    : (1, d_k)
    #   mask_ref : (TB, 1, l)   int8, nonzero => masked
    #   out_ref  : (TB, 1, d_k)
    #   attn_ref : (TB, 1, l)
    q = q_ref[...]
    k = k_ref[...]
    wT = wT_ref[...]
    bias = b_ref[...]
    mask = mask_ref[...]

    # Linear on the MXU: qs = q @ W^T + b; fold 1/temperature into the small
    # (TB, d_k) tensor rather than the (TB, l) scores.
    qs = jnp.dot(q, wT, preferred_element_type=jnp.float32)
    qs = (qs + bias.astype(jnp.float32)) * inv_temperature            # (TB, d_k)

    # Scores: batched MXU contraction over d_k (no (TB,l,d_k) temporary).
    qs3 = qs.astype(k.dtype)[:, None, :]                              # (TB, 1, d_k)
    scores = jnp.einsum("bqd,bld->bql", qs3, k,
                        preferred_element_type=jnp.float32)           # (TB, 1, l)

    # Mask: large finite negative (safer than -inf for all-masked rows).
    scores = jnp.where(mask != 0, -1e30, scores)

    # Softmax over l.
    m = jnp.max(scores, axis=-1, keepdims=True)                       # (TB, 1, 1)
    p = jnp.exp(scores - m)                                           # EUP
    s = jnp.sum(p, axis=-1, keepdims=True)                            # (TB, 1, 1)
    inv = pl.reciprocal(s, approx=True)                               # EUP slot
    inv = inv * (2.0 - s * inv)                                       # Newton refine
    attn = p * inv                                                    # (TB, 1, l)

    # Output: batched MXU contraction over l (v == k).
    out = jnp.einsum("bql,bld->bqd", attn.astype(k.dtype), k,
                     preferred_element_type=jnp.float32)              # (TB, 1, d_k)

    out_ref[...] = out.astype(out_ref.dtype)
    attn_ref[...] = attn.astype(attn_ref.dtype)


def _pick_batch_tile(b, l, d_k, itemsize, target_bytes=1 << 20, max_tile=128):
    """Batch tile: ~1 MiB of k per buffer, multiple of 8 (sublane rule),
    conservative enough for v7x's 64 MiB VMEM with double-buffering."""
    per_row = max(1, l * d_k * itemsize)
    tb = min(max_tile, max(8, target_bytes // per_row))
    tb = (tb // 8) * 8
    if b <= tb:
        return b                     # single tile covers the batch
    return tb                        # multiple of 8


def att_pool_layer(q, k, w_qs, b_qs, mask=None):
    b, d_q = q.shape
    bk, l, d_k = k.shape
    assert bk == b
    inv_temperature = float(1.0 / np.power(d_k, 0.5))

    # Layout plumbing in the wrapper (free at trace time).
    wT = jnp.transpose(w_qs)                         # (d_q, d_k)
    bias2d = b_qs.reshape(1, d_k).astype(jnp.float32)
    if mask is None:
        mask3 = jnp.zeros((b, 1, l), dtype=jnp.int8)
    else:
        mask3 = mask.reshape(b, 1, l).astype(jnp.int8)

    tb = _pick_batch_tile(b, l, d_k, k.dtype.itemsize)
    grid = (pl.cdiv(b, tb),)

    kernel = functools.partial(_attpool_kernel, inv_temperature=inv_temperature)

    out3, attn3 = pl.pallas_call(
        kernel,
        out_shape=(
            jax.ShapeDtypeStruct((b, 1, d_k), q.dtype),
            jax.ShapeDtypeStruct((b, 1, l), jnp.float32),
        ),
        grid=grid,
        in_specs=[
            pl.BlockSpec((tb, d_q), lambda i: (i, 0)),
            pl.BlockSpec((tb, l, d_k), lambda i: (i, 0, 0)),
            pl.BlockSpec((d_q, d_k), lambda i: (0, 0)),   # resident across steps
            pl.BlockSpec((1, d_k), lambda i: (0, 0)),     # resident across steps
            pl.BlockSpec((tb, 1, l), lambda i: (i, 0, 0)),
        ],
        out_specs=(
            pl.BlockSpec((tb, 1, d_k), lambda i: (i, 0, 0)),
            pl.BlockSpec((tb, 1, l), lambda i: (i, 0, 0)),
        ),
        compiler_params=pltpu.CompilerParams(
            dimension_semantics=("parallel",)),           # independent batch tiles
    )(q, k, wT, bias2d, mask3)

    return out3.reshape(b, d_k), attn3.reshape(b, l)


def _reference(q, k, w_qs, b_qs, mask=None):
    d_k = k.shape[-1]
    qs = q @ w_qs.T + b_qs
    attn = jnp.sum(qs[:, None, :] * k, axis=2) / np.power(d_k, 0.5)
    if mask is not None:
        attn = jnp.where(mask, -jnp.inf, attn)
    attn = jax.nn.softmax(attn, axis=1)
    out = jnp.sum(attn[:, :, None] * k, axis=1)
    return out, attn


if __name__ == "__main__":
    b, l, d_q, d_k = 2, 8, 32, 16

    key = jax.random.PRNGKey(0)
    kq, kk, kw, kb, km = jax.random.split(key, 5)

    q = jax.random.normal(kq, (b, d_q), dtype=jnp.float32)
    k = jax.random.normal(kk, (b, l, d_k), dtype=jnp.float32)

    # Deterministic parameter init (mirrors nn.init.normal_ std=sqrt(2/(d_q+d_k))).
    w_qs = jax.random.normal(kw, (d_k, d_q), dtype=jnp.float32) * np.sqrt(2.0 / (d_q + d_k))
    bound = 1.0 / np.sqrt(d_q)
    b_qs = jax.random.uniform(kb, (d_k,), minval=-bound, maxval=bound, dtype=jnp.float32)

    # Optional mask: mask a few positions, never a full row.
    mask = (jax.random.uniform(km, (b, l)) > 0.8)
    mask = mask.at[:, 0].set(False)

    out, attn = att_pool_layer(q, k, w_qs, b_qs, mask=mask)
    jax.block_until_ready((out, attn))

    ref_out, ref_attn = _reference(q, k, w_qs, b_qs, mask=mask)
    np.testing.assert_allclose(np.asarray(out), np.asarray(ref_out), rtol=1e-5, atol=1e-5)
    np.testing.assert_allclose(np.asarray(attn), np.asarray(ref_attn), rtol=1e-5, atol=1e-5)

    print("KERNEL_OK")
</pallas_src>

<mosaic_0001>
module attributes {stable_mosaic.version = 11 : i64} {
  func.func @_attpool_kernel(%arg0: i32, %arg1: memref<2x32xf32, #tpu.memory_space<vmem>>, %arg2: memref<2x8x16xf32, #tpu.memory_space<vmem>>, %arg3: memref<32x16xf32, #tpu.memory_space<vmem>>, %arg4: memref<1x16xf32, #tpu.memory_space<vmem>>, %arg5: memref<2x1x8xi8, #tpu.memory_space<vmem>>, %arg6: memref<2x1x16xf32, #tpu.memory_space<vmem>>, %arg7: memref<2x1x8xf32, #tpu.memory_space<vmem>>) attributes {dimension_semantics = [#tpu.dimension_semantics<parallel>], iteration_bounds = array<i64: 1>, scalar_prefetch = 0 : i64, scratch_operands = 0 : i64, tpu.core_type = #tpu.core_type<tc>, window_params = [{transform_indices = @transform_0, window_bounds = array<i64: 2, 32>}, {transform_indices = @transform_1, window_bounds = array<i64: 2, 8, 16>}, {pipeline_mode = #tpu.pipeline_mode<synchronous>, transform_indices = @transform_2, window_bounds = array<i64: 32, 16>}, {pipeline_mode = #tpu.pipeline_mode<synchronous>, transform_indices = @transform_3, window_bounds = array<i64: 1, 16>}, {transform_indices = @transform_4, window_bounds = array<i64: 2, 1, 8>}, {transform_indices = @transform_5, window_bounds = array<i64: 2, 1, 16>}, {transform_indices = @transform_6, window_bounds = array<i64: 2, 1, 8>}]} {
    %c0 = arith.constant 0 : index
    %c0_0 = arith.constant 0 : index
    %0 = vector.load %arg1[%c0, %c0_0] : memref<2x32xf32, #tpu.memory_space<vmem>>, vector<2x32xf32>
    %c0_1 = arith.constant 0 : index
    %c0_2 = arith.constant 0 : index
    %c0_3 = arith.constant 0 : index
    %1 = vector.load %arg2[%c0_1, %c0_2, %c0_3] : memref<2x8x16xf32, #tpu.memory_space<vmem>>, vector<2x8x16xf32>
    %c0_4 = arith.constant 0 : index
    %c0_5 = arith.constant 0 : index
    %2 = vector.load %arg3[%c0_4, %c0_5] : memref<32x16xf32, #tpu.memory_space<vmem>>, vector<32x16xf32>
    %c0_6 = arith.constant 0 : index
    %c0_7 = arith.constant 0 : index
    %3 = vector.load %arg4[%c0_6, %c0_7] : memref<1x16xf32, #tpu.memory_space<vmem>>, vector<1x16xf32>
    %c0_8 = arith.constant 0 : index
    %c0_9 = arith.constant 0 : index
    %c0_10 = arith.constant 0 : index
    %4 = vector.load %arg5[%c0_8, %c0_9, %c0_10] : memref<2x1x8xi8, #tpu.memory_space<vmem>>, vector<2x1x8xi8>
    %cst = arith.constant dense<0.000000e+00> : vector<2x16xf32>
    %5 = tpu.matmul %0, %2, %cst {dimension_numbers = #tpu.dot_dimension_numbers<[1], [0], [0], [1], [0, 0, 1, 1], [], []>} : vector<2x32xf32>, vector<32x16xf32>, vector<2x16xf32> -> vector<2x16xf32>
    %6 = vector.broadcast %3 : vector<1x16xf32> to vector<2x16xf32>
    %7 = arith.addf %5, %6 : vector<2x16xf32>
    %cst_11 = arith.constant 2.500000e-01 : f32
    %8 = vector.broadcast %cst_11 : f32 to vector<2x16xf32>
    %9 = arith.mulf %7, %8 : vector<2x16xf32>
    %10 = vector.shape_cast %9 : vector<2x16xf32> to vector<2x1x16xf32>
    "tpu.trace_start"() <{level = 10 : i32, message = "bqd,bld->bql"}> : () -> ()
    %cst_12 = arith.constant dense<0.000000e+00> : vector<2x1x8xf32>
    %11 = tpu.matmul %10, %1, %cst_12 {dimension_numbers = #tpu.dot_dimension_numbers<[2], [2], [1], [1], [0, 0, 0, 1, 1, 1], [0], [0]>} : vector<2x1x16xf32>, vector<2x8x16xf32>, vector<2x1x8xf32> -> vector<2x1x8xf32>
    %c0_i8 = arith.constant 0 : i8
    "tpu.trace_stop"() : () -> ()
    %12 = vector.broadcast %c0_i8 : i8 to vector<2x1x8xi8>
    %13 = arith.cmpi ne, %4, %12 : vector<2x1x8xi8>
    %cst_13 = arith.constant -1.000000e+30 : f32
    %14 = vector.broadcast %cst_13 : f32 to vector<2x1x8xf32>
    %15 = arith.select %13, %14, %11 : vector<2x1x8xi1>, vector<2x1x8xf32>
    %cst_14 = arith.constant dense<0xFF800000> : vector<2x1xf32>
    %16 = vector.multi_reduction <maximumf>, %15, %cst_14 [2] : vector<2x1x8xf32> to vector<2x1xf32>
    %17 = vector.shape_cast %16 : vector<2x1xf32> to vector<2x1x1xf32>
    %18 = vector.broadcast %17 : vector<2x1x1xf32> to vector<2x1x8xf32>
    %19 = arith.subf %15, %18 : vector<2x1x8xf32>
    %20 = math.exp %19 : vector<2x1x8xf32>
    %cst_15 = arith.constant dense<0.000000e+00> : vector<2x1xf32>
    %21 = vector.multi_reduction <add>, %20, %cst_15 [2] : vector<2x1x8xf32> to vector<2x1xf32>
    %22 = vector.shape_cast %21 : vector<2x1xf32> to vector<2x1x1xf32>
    %23 = tpu.reciprocal %22 {approx = true} : vector<2x1x1xf32> -> vector<2x1x1xf32>
    %24 = arith.mulf %22, %23 : vector<2x1x1xf32>
    %cst_16 = arith.constant 2.000000e+00 : f32
    %25 = vector.broadcast %cst_16 : f32 to vector<2x1x1xf32>
    %26 = arith.subf %25, %24 : vector<2x1x1xf32>
    %27 = arith.mulf %23, %26 : vector<2x1x1xf32>
    %28 = vector.broadcast %27 : vector<2x1x1xf32> to vector<2x1x8xf32>
    %29 = arith.mulf %20, %28 : vector<2x1x8xf32>
    "tpu.trace_start"() <{level = 10 : i32, message = "bql,bld->bqd"}> : () -> ()
    %cst_17 = arith.constant dense<0.000000e+00> : vector<2x1x16xf32>
    %30 = tpu.matmul %29, %1, %cst_17 {dimension_numbers = #tpu.dot_dimension_numbers<[2], [1], [1], [2], [0, 0, 0, 1, 1, 2], [0], [0]>} : vector<2x1x8xf32>, vector<2x8x16xf32>, vector<2x1x16xf32> -> vector<2x1x16xf32>
    "tpu.trace_stop"() : () -> ()
    %c0_18 = arith.constant 0 : index
    %c0_19 = arith.constant 0 : index
    %c0_20 = arith.constant 0 : index
    %31 = vector.load %arg6[%c0_18, %c0_19, %c0_20] : memref<2x1x16xf32, #tpu.memory_space<vmem>>, vector<2x1x16xf32>
    tpu.vector_store %arg6[%c0_18, %c0_19, %c0_20], %30 {strides = array<i32>} : memref<2x1x16xf32, #tpu.memory_space<vmem>>, vector<2x1x16xf32>,
    %c0_21 = arith.constant 0 : index
    %c0_22 = arith.constant 0 : index
    %c0_23 = arith.constant 0 : index
    %32 = vector.load %arg7[%c0_21, %c0_22, %c0_23] : memref<2x1x8xf32, #tpu.memory_space<vmem>>, vector<2x1x8xf32>
    tpu.vector_store %arg7[%c0_21, %c0_22, %c0_23], %29 {strides = array<i32>} : memref<2x1x8xf32, #tpu.memory_space<vmem>>, vector<2x1x8xf32>,
    return
  }
  func.func @transform_0(%arg0: i32) -> (i32, i32) {
    %c0_i32 = arith.constant 0 : i32
    %c0_i32_0 = arith.constant 0 : i32
    return %arg0, %c0_i32 : i32, i32
  }
  func.func @transform_1(%arg0: i32) -> (i32, i32, i32) {
    %c0_i32 = arith.constant 0 : i32
    %c0_i32_0 = arith.constant 0 : i32
    %c0_i32_1 = arith.constant 0 : i32
    return %arg0, %c0_i32, %c0_i32_0 : i32, i32, i32
  }
  func.func @transform_2(%arg0: i32) -> (i32, i32) {
    %c0_i32 = arith.constant 0 : i32
    %c0_i32_0 = arith.constant 0 : i32
    %c0_i32_1 = arith.constant 0 : i32
    return %c0_i32, %c0_i32_0 : i32, i32
  }
  func.func @transform_3(%arg0: i32) -> (i32, i32) {
    %c0_i32 = arith.constant 0 : i32
    %c0_i32_0 = arith.constant 0 : i32
    %c0_i32_1 = arith.constant 0 : i32
    return %c0_i32, %c0_i32_0 : i32, i32
  }
  func.func @transform_4(%arg0: i32) -> (i32, i32, i32) {
    %c0_i32 = arith.constant 0 : i32
    %c0_i32_0 = arith.constant 0 : i32
    %c0_i32_1 = arith.constant 0 : i32
    return %arg0, %c0_i32, %c0_i32_0 : i32, i32, i32
  }
  func.func @transform_5(%arg0: i32) -> (i32, i32, i32) {
    %c0_i32 = arith.constant 0 : i32
    %c0_i32_0 = arith.constant 0 : i32
    %c0_i32_1 = arith.constant 0 : i32
    return %arg0, %c0_i32, %c0_i32_0 : i32, i32, i32
  }
  func.func @transform_6(%arg0: i32) -> (i32, i32, i32) {
    %c0_i32 = arith.constant 0 : i32
    %c0_i32_0 = arith.constant 0 : i32
    %c0_i32_1 = arith.constant 0 : i32
    return %arg0, %c0_i32, %c0_i32_0 : i32, i32, i32
  }
}

</mosaic_0001>

<bundles_post_ra>
// kernel: tpu_custom_call.1
= control target key start
LH: loop header
LB: loop body
LE: loop exit
PB: predicated region body
PF: predicated region fallthrough
CT: control target
= control target key end

     0   :  { %12 = vsyncpa [#allocation3], 0  ;;  %s399_s0 = inlined_call_operand.vmem [shape: f32[2,32], index: 0, kind: input, shape index: {}]   ;;  %s400_s1 = inlined_call_operand.vmem [shape: f32[2,8,16], index: 1, kind: input, shape index: {}]   ;;  %s401_s2 = inlined_call_operand.vmem [shape: f32[32,16], index: 2, kind: input, shape index: {}]   ;;  %s402_s3 = inlined_call_operand.vmem [shape: f32[1,16], index: 3, kind: input, shape index: {}]   ;;  %s403_s4 = inlined_call_operand.vmem [shape: s8[2,1,8], index: 4, kind: input, shape index: {}]   ;;  %s404_s5 = inlined_call_operand.hbm [shape: f32[2,1,16], index: 5, kind: output, shape index: {0}]   ;;  %s405_s6 = inlined_call_operand.hbm [shape: f32[2,1,8], index: 6, kind: output, shape index: {1}]  }
   0x1   :  { %v32_v0 = vld [vmem:[%s401_s2 + $0x18] sm:$0xff]  ;;  %v31_v1 = vld [vmem:[%s401_s2 + $0x10] sm:$0xff]  ;;  %v30_v2 = vld [vmem:[%s401_s2 + $0x8] sm:$0xff] }
   0x2   :  { %55 = vmatpush.msra.mxu0 %v32_v0 }
   0x3   :  { %13 = vsyncpa [#allocation5], 0  ;;  %v29_v3 = vld [vmem:[%s401_s2] sm:$0xff]  ;;  %vm39_vm0 = vcmask 261120   ;;  %vm66_vm1 = vcmask 130048   ;;  %v28_v6 = vld [vmem:[%s400_s1 + $0x8] sm:$0xff] }
   0x4   :  { %56 = vmatpush.msra.mxu0 %v31_v1  ;;  %v26_v4 = vld [vmem:[%s399_s0] sm:$0x3]  ;;  %247 = vmatpush.xpose.msk.msra.mxu2 %vm66_vm1, %v28_v6  ;;  %v317_v13 = vmov 0   ;;  %vm127_vm5 = vcmask 57344   ;;  %vm156_vm7 = vcmask 64512   ;;  %s227_s16 = sshll.u32 %s405_s6, 4  ;;  %s228_s16 = int_to_ptr.hbm [resolvable:$true] %s227_s16 }
   0x5   :  { %v27_v5 = vld [vmem:[%s400_s1] sm:$0xff]  ;;  %s319_s17 = smov 16   ;;  %s320_s18 = smov 1   ;;  %vm203_vm8 = vcmask 122880  }
   0x6   :  { %57 = vmatpush.msra.mxu0 %v30_v2  ;;  %245 = vmatpush.xpose.msk.msra.mxu1 %vm66_vm1, %v27_v5  ;;  %v256_v7 = vld [vmem:[%s402_s3] ss:$0 sm:$0xff]  ;;  %v35_v15 = vld [vmem:[%s403_s4 + $0x1] sm:$0x1]  ;;  %s318_s3 = smov [#allocation4]   ;;  %s321_s19 = smov [#allocation2]  }
   0x7   :  { %175 = vmatpush.msra.mxu3 %v27_v5  ;;  %v34_v12 = vld [vmem:[%s403_s4] sm:$0x1]  ;;  %vm118_vm3 = vnez %v35_v15  ;;  %s225_s4 = sshll.u32 %s318_s3, 4  ;;  %s212_s20 = sshll.u32 %s321_s19, 4  ;;  %s226_s4 = int_to_ptr.vmem [resolvable:$true] %s225_s4  ;;  %s213_s20 = int_to_ptr.vmem [resolvable:$true] %s212_s20 }
   0x8   :  { %58 = vmatpush.msra.mxu0 %v29_v3  ;;  %vm117_vm2 = vnez %v34_v12  ;;  %v120_v17 = vsel %vm118_vm3, 16843009, %v317_v13  ;;  %s214_s23 = sshll.u32 %s404_s5, 4  ;;  %s215_s23 = int_to_ptr.hbm [resolvable:$true] %s214_s23 }
   0x9   :  { %244 = vmatmul.msk.f32.vlgmr.msra.gmra.mxu0 %vm39_vm0, %v26_v4  ;;  %198 = vmatpush.msrb.mxu3 %v28_v6  ;;  %v119_v14 = vsel %vm117_vm2, 16843009, %v317_v13  ;;  %v122_v21 = vunpack.c.0.s8 %v120_v17 }
   0xa   :  { %v121_v16 = vunpack.c.0.s8 %v119_v14 }
   0xb   :  { %vm124_vm6 = vcmp.ne.s32.totalorder %v122_v21, 0 }
   0xc   :  { %vm123_vm4 = vcmp.ne.s32.totalorder %v121_v16, 0 }
  0x86   :  { %v60_v8 = vpop.f32.mrf.mxu0 }
  0x87   :  { %v61_v9 = vadd.f32 %v256_v7, %v60_v8 }
  0x89   :  { %v63_v10 = vmul.f32 0.25, %v61_v9 }
  0x8b   :  { %v65_v11 = vrot.slane %v63_v10, 1  ;;  %246 = vmatmul.msk.f32.vlgmr.msra.gmra.mxu1 %vm66_vm1, %v63_v10 }
  0x8d   :  { %248 = vmatmul.msk.f32.vlgmr.msra.gmra.mxu2 %vm66_vm1, %v65_v11 }
 0x108   :  { %v89_v18 = vpop.f32.mrf.mxu1 }
 0x109   :  { %v125_v19 = vsel %vm123_vm4, -1e+30, %v89_v18 }
 0x10a   :  { %v128_v20 = vsel %vm127_vm5, %v125_v19, -inf }
 0x10b   :  { %129 = vmax.xlane.f32.xlu0 %v128_v20 }
 0x110   :  { %v114_v22 = vpop.f32.mrf.mxu2 }
 0x111   :  { %v126_v23 = vsel %vm124_vm6, -1e+30, %v114_v22 }
 0x112   :  { %v131_v24 = vsel %vm127_vm5, %v126_v23, -inf }
 0x113   :  { %132 = vmax.xlane.f32.xlu0 %v131_v24 }
 0x17e   :  { %v130_v25 = vpop.xlane.xlu0 %129 }
 0x17f   :  { %v134_v26 = vsub.f32 %v125_v19, %v130_v25 }
 0x181   :  { %v136_v27 = vmul.f32 1.442695, %v134_v26 }
 0x183   :  { %257 = vpow2.f32 %v136_v27 }
 0x186   :  { %v133_v28 = vpop.xlane.xlu0 %132 }
 0x187   :  { %v135_v29 = vsub.f32 %v126_v23, %v133_v28 }
 0x189   :  { %v258_v30 = vpop.eup %257  ;;  %v138_v31 = vmul.f32 1.442695, %v135_v29 }
 0x18a   :  { %v140_v32 = vsel %vm127_vm5, %v258_v30, 0.0 }
 0x18b   :  { %259 = vpow2.f32 %v138_v31  ;;  %141 = vadd.xlane.f32.xlu1 %v140_v32 }
 0x191   :  { %v260_v33 = vpop.eup %259 }
 0x192   :  { %v143_v34 = vsel %vm127_vm5, %v260_v33, 0.0 }
 0x193   :  { %144 = vadd.xlane.f32.xlu1 %v143_v34 }
 0x1fe   :  { %v142_v35 = vpop.xlane.xlu1 %141 }
 0x1ff   :  { %261 = vrcp.f32 %v142_v35 }
 0x205   :  { %v262_v36 = vpop.eup %261 }
 0x206   :  { %v148_v37 = vmul.f32 %v262_v36, %v142_v35  ;;  %v145_v38 = vpop.xlane.xlu1 %144 }
 0x207   :  { %263 = vrcp.f32 %v145_v38 }
 0x208   :  { %v150_v39 = vsub.f32 2.0, %v148_v37 }
 0x20a   :  { %v152_v40 = vmul.f32 %v262_v36, %v150_v39 }
 0x20c   :  { %v154_v41 = vmul.f32 %v258_v30, %v152_v40 }
 0x20d   :  { %v264_v42 = vpop.eup %263 }
 0x20e   :  { %v149_v43 = vmul.f32 %v264_v42, %v145_v38  ;;  %249 = vmatmul.msk.f32.vlgmr.msra.gmra.mxu3 %vm156_vm7, %v154_v41  ;;  %206 = vst.msk [vmem:[#allocation4] sm:$0x1] %vm127_vm5, %v154_v41 }
 0x210   :  { %v151_v44 = vsub.f32 2.0, %v149_v43 }
 0x212   :  { %v153_v45 = vmul.f32 %v264_v42, %v151_v44 }
 0x214   :  { %v155_v46 = vmul.f32 %v260_v33, %v153_v45 }
 0x216   :  { %207 = vst.msk [vmem:[#allocation4 + $0x1] sm:$0x1] %vm127_vm5, %v155_v46  ;;  %250 = vmatmul.msk.f32.vlgmr.msrb.gmra.mxu3 %vm156_vm7, %v155_v46 }
 0x217   :  { %233 = dma.vmem_to_hbm [thread:$0]  %s226_s4, 32, %s228_s16, [#allocation5], %s319_s17, %s319_s17, %s320_s18  }
 0x291   :  { %v177_v47 = vpop.f32.mrf.mxu3 }
 0x292   :  { %204 = vst.msk [vmem:[#allocation2] sm:$0x1] %vm203_vm8, %v177_v47 }
 0x299   :  { %v200_v48 = vpop.f32.mrf.mxu3 }
 0x29a   :  { %205 = vst.msk [vmem:[#allocation2 + $0x1] sm:$0x1] %vm203_vm8, %v200_v48 }
 0x29b   :  { %220 = dma.vmem_to_hbm [thread:$0]  %s213_s20, 32, %s215_s23, [#allocation3], %s319_s17, %s319_s17, %s320_s18  }
 0x29c   :  { %313 = dma.done.wait [#allocation3], 32  }
 0x29d   :  { %314 = vsyncadd [#allocation3], 4294967264 }
 0x29e   :  { %315 = dma.done.wait [#allocation5], 32  }
 0x29f   :  { %316 = vsyncadd [#allocation5], 4294967264 }
 0x2a0   :  { %242 = vsyncpa [#allocation3], 1 }
 0x2a1   :  { %243 = vsyncpa [#allocation5], 1 }

</bundles_post_ra>
